<compile_context>
chip_gen: v7x
topology: tpu7x:2x2x1
jax: 0.10.0
libtpu: 0.0.40
codegen_flags: <defaults>
</compile_context>

<pallas_src>
import jax
import jax.numpy as jnp
from jax.experimental import pallas as pl
from jax.experimental.pallas import tpu as pltpu


_LANES = 128
_SUBLANES = 8
# ~2 MiB per buffer: safe on every generation (v5e 16 MiB scoped default with 4
# live double-buffered tiles) and large enough to hide per-step overhead.
_TARGET_TILE_BYTES = 2 * 1024 * 1024


def _swish_kernel(sp_ref, x_ref, o_ref):
    # sp_ref: (1,) f32 in SMEM holding softplus(beta), precomputed in wrapper.
    # x_ref / o_ref: (tile_rows, 128) VMEM tiles.
    sp = sp_ref[0]
    x = x_ref[...].astype(jnp.float32)
    z = x * sp
    # exp -> EUP; 1/(1+e) divide -> VALU.  Exact sigmoid; all hidden under DMA.
    sig = 1.0 / (1.0 + jnp.exp(-z))
    o_ref[...] = (x * sig * jnp.float32(1.0 / 1.1)).astype(o_ref.dtype)


def _pick_tile_rows(rows, itemsize):
    if rows <= _SUBLANES:
        # Full-extent block along the sublane dim is always layout-legal.
        return rows
    tile_rows = _TARGET_TILE_BYTES // (_LANES * itemsize)
    tile_rows = max(_SUBLANES, (tile_rows // _SUBLANES) * _SUBLANES)
    tile_rows = min(tile_rows, pl.cdiv(rows, _SUBLANES) * _SUBLANES)
    # Keep the grid >= 2 steps when possible so both TensorCores get work on
    # v7x (megacore sharding of the "parallel" axis).
    if pl.cdiv(rows, tile_rows) < 2 and rows >= 2 * _SUBLANES:
        tile_rows = pl.cdiv(pl.cdiv(rows, 2), _SUBLANES) * _SUBLANES
    return tile_rows


def _swish_2d(x2d, sp_arr):
    """Run the Pallas kernel on a (rows, 128) lane-dense slab."""
    rows, lanes = x2d.shape
    assert lanes == _LANES
    tile_rows = _pick_tile_rows(rows, jnp.dtype(x2d.dtype).itemsize)
    grid = (pl.cdiv(rows, tile_rows),)

    return pl.pallas_call(
        _swish_kernel,
        out_shape=jax.ShapeDtypeStruct((rows, _LANES), x2d.dtype),
        grid_spec=pltpu.PrefetchScalarGridSpec(
            num_scalar_prefetch=0,
            grid=grid,
            in_specs=[
                pl.BlockSpec(memory_space=pltpu.MemorySpace.SMEM),  # softplus(beta)
                pl.BlockSpec((tile_rows, _LANES), lambda i: (i, 0)),
            ],
            out_specs=pl.BlockSpec((tile_rows, _LANES), lambda i: (i, 0)),
        ),
        compiler_params=pltpu.CompilerParams(
            dimension_semantics=("parallel",),
        ),
    )(sp_arr, x2d)


def swish(x, beta):
    """Elementwise Swish with learnable beta: (x * sigmoid(x*softplus(beta))) / 1.1."""
    orig_shape = x.shape
    n = x.size

    # Stable softplus, computed once per call (not per grid step).
    sp_arr = jax.nn.softplus(jnp.asarray(beta, dtype=jnp.float32)).reshape((1,))

    n_main = (n // _LANES) * _LANES
    if n_main == n and n > 0:
        # Fast path: reshape to (rows, 128) is free; no pad / slice copies, so
        # HBM traffic is exactly one read + one write of x.
        out2d = _swish_2d(x.reshape(n // _LANES, _LANES), sp_arr)
        return out2d.reshape(orig_shape)

    # Ragged path (rare for conv activations): kernel on the 128-divisible
    # prefix, plain jnp on the (<128-element) tail.  Avoids padding the whole
    # array; the prefix slice / final concat are the only extra copies.
    x_flat = x.reshape(-1)
    sp = sp_arr[0]
    tail_in = x_flat[n_main:].astype(jnp.float32)
    tail = (tail_in * jax.nn.sigmoid(tail_in * sp) / 1.1).astype(x.dtype)
    if n_main == 0:
        return tail.reshape(orig_shape)
    main = _swish_2d(x_flat[:n_main].reshape(n_main // _LANES, _LANES), sp_arr)
    return jnp.concatenate([main.reshape(-1), tail]).reshape(orig_shape)


def swish_ref(x, beta):
    """Pure-JAX reference matching the PyTorch forward."""
    sp = jax.nn.softplus(jnp.asarray(beta, dtype=jnp.float32))
    xf = x.astype(jnp.float32)
    return ((xf * jax.nn.sigmoid(xf * sp)) / 1.1).astype(x.dtype)


if __name__ == "__main__":
    key = jax.random.PRNGKey(0)
    # Deterministic parameter init, matching nn.Parameter(torch.tensor([0.5]))
    beta = jnp.array([0.5], dtype=jnp.float32)

    # Small NCHW input, as a typical conv activation would see (2048 elems,
    # 128-divisible -> fast lane-dense path).
    x = jax.random.normal(key, (2, 4, 16, 16), dtype=jnp.float32)
    out = jax.block_until_ready(swish(x, beta))
    ref = swish_ref(x, beta)
    assert out.shape == x.shape and out.dtype == x.dtype
    assert jnp.allclose(out, ref, atol=1e-5, rtol=1e-5)

    # Ragged shape to exercise the prefix-kernel + jnp-tail path.
    x2 = jax.random.normal(jax.random.PRNGKey(1), (2, 3, 67), dtype=jnp.float32)
    out2 = jax.block_until_ready(swish(x2, beta))
    ref2 = swish_ref(x2, beta)
    assert out2.shape == x2.shape and out2.dtype == x2.dtype
    assert jnp.allclose(out2, ref2, atol=1e-5, rtol=1e-5)

    print("KERNEL_OK")
</pallas_src>

<mosaic_0001>
module attributes {stable_mosaic.version = 11 : i64} {
  func.func @_swish_kernel(%arg0: i32, %arg1: memref<1xf32, #tpu.memory_space<smem>>, %arg2: memref<8x128xf32, #tpu.memory_space<vmem>>, %arg3: memref<8x128xf32, #tpu.memory_space<vmem>>) attributes {dimension_semantics = [#tpu.dimension_semantics<parallel>], iteration_bounds = array<i64: 2>, scalar_prefetch = 0 : i64, scratch_operands = 0 : i64, tpu.core_type = #tpu.core_type<tc>, window_params = [{transform_indices = @transform_0, window_bounds = array<i64: 1>}, {transform_indices = @transform_1, window_bounds = array<i64: 8, 128>}, {transform_indices = @transform_2, window_bounds = array<i64: 8, 128>}]} {
    %c0 = arith.constant 0 : index
    %0 = memref.load %arg1[%c0] : memref<1xf32, #tpu.memory_space<smem>>
    %c0_0 = arith.constant 0 : index
    %c0_1 = arith.constant 0 : index
    %1 = vector.load %arg2[%c0_0, %c0_1] : memref<8x128xf32, #tpu.memory_space<vmem>>, vector<8x128xf32>
    %2 = vector.broadcast %0 : f32 to vector<8x128xf32>
    %3 = arith.mulf %1, %2 : vector<8x128xf32>
    %cst = arith.constant 0.000000e+00 : f32
    %4 = vector.broadcast %cst : f32 to vector<8x128xf32>
    %5 = arith.subf %4, %3 : vector<8x128xf32>
    %6 = math.exp %5 : vector<8x128xf32>
    %cst_2 = arith.constant 1.000000e+00 : f32
    %7 = vector.broadcast %cst_2 : f32 to vector<8x128xf32>
    %8 = arith.addf %7, %6 : vector<8x128xf32>
    %cst_3 = arith.constant 1.000000e+00 : f32
    %9 = vector.broadcast %cst_3 : f32 to vector<8x128xf32>
    %10 = arith.divf %9, %8 : vector<8x128xf32>
    %11 = arith.mulf %1, %10 : vector<8x128xf32>
    %cst_4 = arith.constant 0.909090936 : f32
    %12 = vector.broadcast %cst_4 : f32 to vector<8x128xf32>
    %13 = arith.mulf %11, %12 : vector<8x128xf32>
    %c0_5 = arith.constant 0 : index
    %c0_6 = arith.constant 0 : index
    %14 = vector.load %arg3[%c0_5, %c0_6] : memref<8x128xf32, #tpu.memory_space<vmem>>, vector<8x128xf32>
    tpu.vector_store %arg3[%c0_5, %c0_6], %13 {strides = array<i32>} : memref<8x128xf32, #tpu.memory_space<vmem>>, vector<8x128xf32>,
    return
  }
  func.func @transform_0(%arg0: i32) -> i32 {
    %c0_i32 = arith.constant 0 : i32
    %c0_i32_0 = arith.constant 0 : i32
    return %c0_i32 : i32
  }
  func.func @transform_1(%arg0: i32) -> (i32, i32) {
    %c0_i32 = arith.constant 0 : i32
    %c0_i32_0 = arith.constant 0 : i32
    return %arg0, %c0_i32 : i32, i32
  }
  func.func @transform_2(%arg0: i32) -> (i32, i32) {
    %c0_i32 = arith.constant 0 : i32
    %c0_i32_0 = arith.constant 0 : i32
    return %arg0, %c0_i32 : i32, i32
  }
}

</mosaic_0001>

<bundles_post_ra>
// kernel: tpu_custom_call.1
= control target key start
LH: loop header
LB: loop body
LE: loop exit
PB: predicated region body
PF: predicated region fallthrough
CT: control target
= control target key end

     0   :  { %s598_s0 = inlined_call_operand.<no memory space> [shape: f32[1], index: 0, kind: input, shape index: {}]   ;;  %s599_s1 = inlined_call_operand.hbm [shape: f32[16,128], index: 1, kind: input, shape index: {}]   ;;  %s600_s2 = inlined_call_operand.hbm [shape: f32[16,128], index: 2, kind: output, shape index: {}]  }
   0x1   :  { %7 = sst [smem:[#allocation2]] %s598_s0 }
   0x2   :  { %8 = vsyncpa [#allocation4], 0 }
   0x3   :  { %10 = vsyncpa [#allocation4 + $0x1], 0 }
   0x4   :  { %11 = vsyncpa [#allocation5], 0 }
   0x5   :  { %13 = vsyncpa [#allocation5 + $0x1], 0  ;;  %s437_s11 = smov 0   ;;  %s439_s12 = smov 0  }
   0x6   :  { %s441_s13 = smov 0   ;;  %s443_s14 = smov 0  }
   0x7 LB: > { %s458_s0 = sadd.s32 4294967295, %s415_s14   ;;  %s257_s15 = sadd.s32 4294967294, %s415_s14   ;;  %s415_s14 = sphi %s443_s14, %s615_s14   ;;  %s411_s13 = sphi %s441_s13, %s614_s13   ;;  %s407_s12 = sphi %s439_s12, %s613_s12   ;;  %s403_s11 = sphi %s437_s11, %s612_s11  }
   0x8   : > { %s462_s16 = sadd.s32 1, %s415_s14   ;;  %s47_s17 = sadd.s32 1, %s411_s13 }
   0x9   : > { %s44_s18 = ssub.s32 %s415_s14, %s462_s16  ;;  %p54_p0 = scmp.ne.s32.totalorder %s411_s13, %s407_s12 }
   0xa   : > { %p45_p1 = scmp.eq.s32.totalorder %s44_s18, 0  ;;  %p55_p2 = scmp.eq.s32.totalorder %s415_s14, 0 }
   0xb   : > { %p60_p3 = scmp.ne.s32.totalorder %s407_s12, %s403_s11  ;;  %p61_p4 = scmp.eq.s32.totalorder %s458_s0, 0 }
   0xc   : > { %s474_s19 = scalar_select %p45_p1, %s411_s13, %s47_s17  }
   0xd   : > { %p476_p5 = por %p55_p2, %p54_p0  ;;  %p480_p6 = por %p61_p4, %p60_p3 }
   0xe   : > { %p84_p7 = scmp.eq.s32.totalorder %s458_s0, 1  ;;  %p90_p8 = scmp.eq.s32.totalorder %s257_s15, 1 }
   0xf   : > { %p281_p10 = scmp.lt.s32.totalorder %s415_s14, 2  ;;  %s113_s24 = sand.u32 1, %s411_s13  }
  0x10   : > { %p487_p11 = por %p84_p7, %p54_p0  ;;  %p491_p12 = por %p90_p8, %p60_p3 }
  0x11   : > { %s261_s25 = sshll.u32 %s415_s14, 7  ;;  %s260_s26 = sshll.u32 %s113_s24, 3 }
  0x12   : > { %s604_s22 = scalar_select %p487_p11, 1, 0 }
  0x13   : > { %s605_s23 = scalar_select %p491_p12, 1, 0 }
  0x14   : > { %s500_s29 = scalar_lea.hbm %s599_s1, %s261_s25  ;;  %s117_s30 = scalar_lea.vmem [#allocation3], %s260_s26 }
  0x15   : > { %s124_s3 = sshll.u32 %s117_s30, 4  ;;  %p504_p13 = pnand %p281_p10, %p476_p5  ;;  %s508_s3 = int_to_ptr.vmem [resolvable:$true] %s124_s3 }
  0x16   : > { %s114_s5 = scalar_lea.sflag [#allocation4], %s113_s24  ;;  %s319_s6 = scalar_lea.hbm %s500_s29, 128 }
  0x17   : > { %p320_p2 = scmp.ne.s32.totalorder %s500_s29, %s319_s6  ;;  %p321_p3 = pneg %p504_p13 }
  0x18   : > { %s324_s9 = scalar_lea.hbm %s599_s1, 256  ;;  %p325_p5 = scmp.lt.u32.totalorder %s500_s29, %s599_s1 }
  0x19   : > { %p322_p4 = pnand %p321_p3, %p320_p2  ;;  %p326_p8 = scmp.lt.u32.totalorder %s324_s9, %s319_s6 }
  0x1a   : > { %p328_p9 = scmp.lt.u32.totalorder %s319_s6, %s500_s29 }
  0x1b   : > { %p323_p7 = pneg %p322_p4  ;;  %p327_p10 = por %p326_p8, %p325_p5 }
  0x1d   : > { %p329_p0 = por %p328_p9, %p327_p10 }
  0x1f   : > { %p330_p1 = pnand %p329_p0, %p323_p7 }
  0x21   : > { %333 = shalt.err (!%p330_p1)
}
  0x22   : > { %s334_s17 = scalar_lea.vmem %s508_s3, 128  ;;  %s417_s18 = smov [#allocation3]  }
  0x23   : > { %p335_p2 = scmp.ne.s32.totalorder %s508_s3, %s334_s17  ;;  %s339_s20 = sshll.u32 %s417_s18, 4  ;;  %s340_s20 = int_to_ptr.vmem [resolvable:$false] %s339_s20 }
  0x24   : > { %s341_s24 = scalar_lea.vmem %s340_s20, 256  ;;  %p342_p11 = scmp.lt.s32.totalorder %s508_s3, %s340_s20 }
  0x25   : > { %p337_p4 = pnand %p335_p2, %p321_p3  ;;  %p343_p5 = scmp.lt.s32.totalorder %s341_s24, %s334_s17 }
  0x27   : > { %p338_p12 = pneg %p337_p4  ;;  %p344_p8 = por %p343_p5, %p342_p11 }
  0x29   : > { %p345_p9 = pnand %p344_p8, %p338_p12 }
  0x2b   : > { %348 = shalt.err (!%p345_p9)
}
  0x2c   : > { %276 = dma.hbm_to_vmem [thread:$0]  (!%p504_p13), %s500_s29, 128, %s508_s3, %s114_s5  }
  0x2d   : > { %p607_p0 = scmp.lt.s32.totalorder %s415_s14, 3  ;;  %p608_p1 = scmp.ge.s32.totalorder %s415_s14, 1 }
  0x2f   : > { %p130_p3 = pnand %p608_p1, %p607_p0 }
  0x30   : > { %s542_s25 = sand.u32 (!%p130_p3), 1, %s407_s12  }
  0x31   : > { %133 = sbr.rel (%p130_p3) target bundleno = 112 (0x70), region = 28  ;;  %s263_s26 = sshll.u32 (!%p130_p3), %s542_s25, 3 }
  0x32   : > { %s136_s27 = scalar_lea.sflag (!%p130_p3), [#allocation4], %s542_s25  ;;  %s139_s28 = scalar_lea.vmem (!%p130_p3), [#allocation3], %s263_s26 }
  0x38   : > { %394 = dma.done.wait (%p480_p6), %s136_s27, 128  }
  0x39   : > { %396 = vsyncadd (%p480_p6), %s136_s27, 4294967168  ;;  %s160_s29 = sld [smem:[#allocation2]]  ;;  %v161_v1 = vld [vmem:[%s139_s28] sm:$0xff]  ;;  %s159_s30 = scalar_lea.vmem [#allocation6], %s263_s26 }
  0x3a   : > { %s187_s3 = sshll.u32 %s159_s30, 4  ;;  %s266_s4 = sshll.u32 %s458_s0, 7  ;;  %s551_s3 = int_to_ptr.vmem [resolvable:$true] %s187_s3 }
  0x3b   : > { %s556_s6 = scalar_lea.hbm %s600_s2, %s266_s4  ;;  %s174_s7 = scalar_lea.sflag [#allocation5], %s542_s25 }
  0x3c   : > { %s349_s8 = scalar_lea.vmem %s551_s3, 128  ;;  %p609_p11 = scmp.ne.s32.totalorder %s604_s22, 0 }
  0x3d   : > { %p350_p6 = scmp.ne.s32.totalorder %s551_s3, %s349_s8  ;;  %s418_s0 = smov [#allocation6]  }
  0x3e   : > { %s353_s9 = sshll.u32 %s418_s0, 4  ;;  %s354_s9 = int_to_ptr.vmem [resolvable:$false] %s353_s9 }
  0x3f   : > { %v162_v0 = vstv %s160_s29  ;;  %p351_p12 = pnand %p350_p6, %p609_p11  ;;  %s355_s10 = scalar_lea.vmem %s354_s9, 256 }
  0x40   : > { %v163_v2 = vmul.f32 %v162_v0, %v161_v1  ;;  %p356_p7 = scmp.lt.s32.totalorder %s551_s3, %s354_s9  ;;  %p357_p10 = scmp.lt.s32.totalorder %s355_s10, %s349_s8 }
  0x41   : > { %p352_p13 = pneg %p351_p12 }
  0x42   : > { %v164_v3 = vsub.f32 0.0, %v163_v2  ;;  %p358_p2 = por %p357_p10, %p356_p7 }
  0x44   : > { %v165_v4 = vmul.f32 1.442695, %v164_v3  ;;  %p359_p4 = pnand %p358_p2, %p352_p13 }
  0x46   : > { %315 = vpow2.f32 %v165_v4 }
  0x50   : > { %v316_v5 = vpop.eup %315 }
  0x51   : > { %v167_v6 = vadd.f32 1.0, %v316_v5 }
  0x53   : > { %317 = vrcp.f32 %v167_v6 }
  0x5d   : > { %v318_v7 = vpop.eup %317 }
  0x5e   : > { %v170_v8 = vmul.f32 %v318_v7, %v161_v1 }
  0x60   : > { %v171_v9 = vmul.f32 0.90909094, %v170_v8 }
  0x62   : > { %172 = vst [vmem:[%s159_s30] sm:$0xff] %v171_v9 }
  0x63   : > { %362 = shalt.err (!%p359_p4)
}
  0x64   : > { %s363_s15 = scalar_lea.hbm %s556_s6, 128  ;;  %s367_s20 = scalar_lea.hbm %s600_s2, 256 }
  0x65   : > { %p364_p5 = scmp.ne.s32.totalorder %s556_s6, %s363_s15  ;;  %p368_p0 = scmp.lt.u32.totalorder %s556_s6, %s600_s2 }
  0x66   : > { %p369_p1 = scmp.lt.u32.totalorder %s367_s20, %s363_s15  ;;  %p371_p6 = scmp.lt.u32.totalorder %s363_s15, %s556_s6 }
  0x67   : > { %p365_p8 = pnand %p364_p5, %p609_p11 }
  0x68   : > { %p370_p3 = por %p369_p1, %p368_p0 }
  0x69   : > { %p366_p9 = pneg %p365_p8 }
  0x6a   : > { %p372_p12 = por %p371_p6, %p370_p3 }
  0x6c   : > { %p373_p13 = pnand %p372_p12, %p366_p9 }
  0x6e   : > { %376 = shalt.err (!%p373_p13)
}
  0x6f   : > { %271 = dma.vmem_to_hbm [thread:$0]  (%p609_p11), %s551_s3, 128, %s556_s6, %s174_s7  }
  0x70 PF: > { %s199_s26 = sand.u32 1, %s403_s11   ;;  %p610_p7 = scmp.ne.s32.totalorder %s605_s23, 0 }
  0x71   : > { %p611_p10 = scmp.ge.s32.totalorder %s415_s14, 2  ;;  %s200_s27 = scalar_lea.sflag [#allocation5], %s199_s26 }
  0x73   : > { %p278_p2 = pnand %p611_p10, %p610_p7 }
  0x75   : > { %398 = dma.done.wait (!%p278_p2), %s200_s27, 128  }
  0x76   : > { %400 = vsyncadd (!%p278_p2), %s200_s27, 4294967168  ;;  %p16_p4 = scmp.ge.s32.totalorder %s462_s16, 4   ;;  %s612_s11 = smov %s407_s12 }
  0x77   : > { %s613_s12 = smov %s411_s13  ;;  %s614_s13 = smov %s474_s19 }
  0x78   : > { %s615_s14 = smov %s462_s16  ;;  %18 = sbr.rel (!%p16_p4) target bundleno = 7 (0x7), region = 73 }
  0x7f   :  { %205 = vsyncpa [#allocation4], 1 }
  0x80   :  { %207 = vsyncpa [#allocation4 + $0x1], 1 }
  0x81   :  { %208 = vsyncpa [#allocation5], 1 }
  0x82   :  { %210 = vsyncpa [#allocation5 + $0x1], 1 }

</bundles_post_ra>
